<compile_context>
chip_gen: v5e
topology: v5e:2x2
jax: 0.10.0
libtpu: 0.0.40
codegen_flags: <defaults>
</compile_context>

<pallas_src>
import functools
import math

import jax
import jax.numpy as jnp
from jax.experimental import pallas as pl
from jax.experimental.pallas import tpu as pltpu


def _round_up(x, m):
    return (x + m - 1) // m * m


def _vmem_capacity_bytes():
    """Best-effort VMEM capacity query (v5e/v6e: 128 MiB; v7x: 64 MiB per TC)."""
    try:
        cap = getattr(pltpu.get_tpu_info(), "vmem_capacity_bytes", None)
        if cap:
            return int(cap)
    except Exception:
        pass
    return 64 << 20  # conservative (v7x-sized) default


# --------------------------------------------------------------------------
# Kernel 1: projection.  h = x @ W (f32 accum, stored bf16), f = h @ [a_src|a_dst].
# Computed ONCE per row tile and reused by every column tile of kernel 2.
# --------------------------------------------------------------------------
def _gat_proj_kernel(x_ref, w_ref, a2_ref, h_ref, f_ref):
    h = jnp.dot(x_ref[...], w_ref[...], preferred_element_type=jnp.float32)
    # single matmul for both attention halves: a2 = [a_src | a_dst] -> (Fp, 2)
    f = jnp.dot(h, a2_ref[...], preferred_element_type=jnp.float32)   # (TM, 2)
    h_ref[...] = h.astype(h_ref.dtype)        # bf16 for the streaming phase
    f_ref[...] = f


# --------------------------------------------------------------------------
# Kernel 2: tiled masked softmax + att @ h with online (flash) accumulation.
#   grid = (row tiles [parallel], column tiles [arbitrary/reduction])
#   cnt_ref: scalar-prefetched per-tile nonzero counts (flattened 1D, SMEM)
# --------------------------------------------------------------------------
def _gat_attn_kernel(cnt_ref, f_src_ref, f_dst_ref, adj_ref, h_ref, out_ref,
                     m_sc, l_sc, acc_sc, *, alpha, concat, resident_h, tn):
    i = pl.program_id(0)
    j = pl.program_id(1)

    @pl.when(j == 0)
    def _():
        m_sc[...] = jnp.full_like(m_sc, -jnp.inf)
        l_sc[...] = jnp.zeros_like(l_sc)
        acc_sc[...] = jnp.zeros_like(acc_sc)

    # Block-sparse tile skipping: an all-zero adj tile contributes exactly 0 to
    # l/acc (mask-multiply), so skipping it leaves the online softmax unchanged.
    @pl.when(cnt_ref[i * pl.num_programs(1) + j] > 0)
    def _():
        # e[i, jj] = leakyrelu(f_src[i] + f_dst[jj])   (TM,1)+(1,TN) broadcast
        e = f_src_ref[...] + f_dst_ref[...]
        e = jnp.maximum(e, alpha * e)                  # LeakyReLU, 0 < alpha < 1
        mask = adj_ref[...].astype(jnp.float32)        # {0,1} from int8

        # online softmax; running max over UNMASKED e (upper bound of masked max)
        m_prev = m_sc[...]
        m_new = jnp.maximum(m_prev, jnp.max(e, axis=1, keepdims=True))
        scale = jnp.exp(m_prev - m_new)                # 0 on first visited tile
        p = jnp.exp(e - m_new) * mask                  # masked probs (f32)
        l_sc[...] = scale * l_sc[...] + jnp.sum(p, axis=1, keepdims=True)

        if resident_h:
            # full h resident in VMEM; slice this column tile in-kernel
            start = pl.multiple_of(j * tn, tn)
            h_tile = h_ref[pl.ds(start, tn), :]
        else:
            h_tile = h_ref[...]
        acc_sc[...] = scale * acc_sc[...] + jnp.dot(
            p.astype(jnp.bfloat16), h_tile,            # bf16 MXU operands
            preferred_element_type=jnp.float32)
        m_sc[...] = m_new

    @pl.when(j == pl.num_programs(1) - 1)
    def _():
        # exact reciprocal (finalize runs once per row tile -> ~free);
        # eps guard: edge-less / padded rows produce 0 instead of NaN.
        inv_l = 1.0 / jnp.maximum(l_sc[...], 1e-30)
        h_prime = acc_sc[...] * inv_l
        if concat:
            # ELU (default alpha = 1.0)
            h_prime = jnp.where(h_prime > 0, h_prime, jnp.expm1(h_prime))
        out_ref[...] = h_prime.astype(out_ref.dtype)


# --------------------------------------------------------------------------
# Wrapper
# --------------------------------------------------------------------------
def gat_layer(x, W, a, adj_int8, *, alpha, concat=True,
              block_m=None, block_n=None, vmem_limit_bytes=None):
    """x: (N, Fin) f32, W: (Fin, Fout) f32, a: (2*Fout, 1) f32,
    adj_int8: (N, N) int8 (1 where an edge exists)."""
    N, Fin = x.shape
    Fout = W.shape[1]

    # lane-dense output / MXU-filling feature dim
    Fp = _round_up(Fout, 128)

    # Generation-aware tile / VMEM defaults.
    #   v7x  (64 MiB VMEM/TC): (1024, 1024) tiles, <=48 MiB scoped VMEM
    #        (budget ~10 B/elem of (tm,tn) for the f32 e/p + bf16 p temporaries).
    #   v5e/v6e (128 MiB):     (1024, 2048) tiles (bigger reduction axis
    #        amortizes the ~0.35 us/step overhead and the acc rescale), 88 MiB.
    vmem_cap = _vmem_capacity_bytes()
    big_vmem = vmem_cap >= (100 << 20)
    if block_m is None:
        block_m = 1024
    if block_n is None:
        block_n = 2048 if big_vmem else 1024
    if vmem_limit_bytes is None:
        vmem_limit_bytes = (88 << 20) if big_vmem else (48 << 20)

    n128 = _round_up(N, 128)
    tm = min(block_m, n128)
    tn = min(block_n, n128)
    n_pad = _round_up(N, math.lcm(tm, tn))
    # v7x megacore: aim for >= 2 row tiles so the "parallel" axis load-balances
    # across both TensorCores (tm stays a multiple of 64 and divides n_pad).
    if n_pad // tm < 2 and n_pad >= 256:
        tm = n_pad // 2

    # zero-pad: ghost nodes have zero features and no edges.
    x_p = jnp.pad(x, ((0, n_pad - N), (0, 0)))
    W_p = jnp.pad(W, ((0, 0), (0, Fp - Fout)))
    a2 = jnp.concatenate([a[:Fout], a[Fout:]], axis=1)          # (Fout, 2)
    a2_p = jnp.pad(a2, ((0, Fp - Fout), (0, 0)))                # (Fp, 2)
    adj_p = jnp.pad(adj_int8, ((0, n_pad - N), (0, n_pad - N)))

    # ---- phase 1: h = x @ W, f = h @ a2 (row-tiled, computed once) ----
    h_bf16, f = pl.pallas_call(
        _gat_proj_kernel,
        grid=(n_pad // tm,),
        out_shape=(jax.ShapeDtypeStruct((n_pad, Fp), jnp.bfloat16),
                   jax.ShapeDtypeStruct((n_pad, 2), jnp.float32)),
        in_specs=[
            pl.BlockSpec((tm, Fin), lambda i: (i, 0)),
            pl.BlockSpec((Fin, Fp), lambda i: (0, 0)),
            pl.BlockSpec((Fp, 2), lambda i: (0, 0)),
        ],
        out_specs=(
            pl.BlockSpec((tm, Fp), lambda i: (i, 0)),
            pl.BlockSpec((tm, 2), lambda i: (i, 0)),
        ),
        compiler_params=pltpu.CompilerParams(
            dimension_semantics=("parallel",)),
    )(x_p, W_p, a2_p)

    # tiny layout plumbing outside the hot loop: f_dst in row (lane) layout so
    # the attention kernel never transposes per tile.
    f_src = f[:, 0:1]              # (n_pad, 1)
    f_dst_row = f[:, 1:2].T        # (1, n_pad)

    nm, nn = n_pad // tm, n_pad // tn
    # per-(row-tile, col-tile) nonzero counts for block-sparse tile skipping;
    # flattened to 1D to keep the SMEM footprint minimal.
    cnt = adj_p.astype(jnp.int32).reshape(nm, tm, nn, tn).sum(axis=(1, 3))
    cnt = cnt.reshape(-1)

    # resident h: keep the whole projected-feature matrix in VMEM across the
    # grid when it fits (2x for buffering headroom), else stream column tiles.
    resident_h = (2 * n_pad * Fp * 2) <= (vmem_limit_bytes // 4)
    if resident_h:
        h_spec = pl.BlockSpec((n_pad, Fp), lambda i, j, cnt: (0, 0))
    else:
        h_spec = pl.BlockSpec((tn, Fp), lambda i, j, cnt: (j, 0))

    # ---- phase 2: tiled online-softmax attention + att @ h ----
    kernel = functools.partial(_gat_attn_kernel, alpha=alpha, concat=concat,
                               resident_h=resident_h, tn=tn)
    out_pad = pl.pallas_call(
        kernel,
        grid_spec=pltpu.PrefetchScalarGridSpec(
            num_scalar_prefetch=1,
            grid=(nm, nn),
            in_specs=[
                pl.BlockSpec((tm, 1), lambda i, j, cnt: (i, 0)),   # f_src rows
                pl.BlockSpec((1, tn), lambda i, j, cnt: (0, j)),   # f_dst cols
                pl.BlockSpec((tm, tn), lambda i, j, cnt: (i, j)),  # adj tile
                h_spec,                                            # h (resident or tile)
            ],
            out_specs=pl.BlockSpec((tm, Fp), lambda i, j, cnt: (i, 0)),
            scratch_shapes=[
                pltpu.VMEM((tm, 1), jnp.float32),    # running max
                pltpu.VMEM((tm, 1), jnp.float32),    # running sum
                pltpu.VMEM((tm, Fp), jnp.float32),   # running att @ h accumulator
            ]),
        out_shape=jax.ShapeDtypeStruct((n_pad, Fp), jnp.float32),
        compiler_params=pltpu.CompilerParams(
            dimension_semantics=("parallel", "arbitrary"),
            vmem_limit_bytes=vmem_limit_bytes),
    )(cnt, f_src, f_dst_row, adj_p, h_bf16)

    return out_pad[:N, :Fout]


# --------------------------------------------------------------------------
# Helpers / reference
# --------------------------------------------------------------------------
def xavier_uniform(key, shape, gain):
    fan_in, fan_out = shape[0], shape[1]
    bound = gain * jnp.sqrt(6.0 / (fan_in + fan_out))
    return jax.random.uniform(key, shape, jnp.float32, -bound, bound)


def edges_to_dense_int8(edge_index, n):
    """COO edge index (2, E) -> dense (N, N) int8 presence mask (matches the
    reference's `adj > 0` test on the summed to_dense matrix)."""
    dense = jnp.zeros((n, n), jnp.int8)
    return dense.at[edge_index[0], edge_index[1]].set(jnp.int8(1))


def gat_reference(x, W, a, adj_i8, alpha, concat):
    """Pure-JAX eval-mode reference of the PyTorch GATLayer forward."""
    Fout = W.shape[1]
    h = x @ W
    f = h @ jnp.concatenate([a[:Fout], a[Fout:]], axis=1)
    e = f[:, 0:1] + f[:, 1:2].T
    e = jnp.where(e > 0, e, alpha * e)
    att = jnp.where(adj_i8 > 0, e, -9.0e15)
    att = jax.nn.softmax(att, axis=1)
    h_prime = att @ h
    return jax.nn.elu(h_prime) if concat else h_prime


if __name__ == "__main__":
    # Small shapes consistent with the module: N nodes, in/out feature dims.
    N, in_features, out_features = 8, 16, 32
    dropout, lrelu_alpha, concat = 0.6, 0.2, True

    key = jax.random.PRNGKey(0)
    k_x, k_w, k_a = jax.random.split(key, 3)

    # Deterministic parameter init (xavier_uniform, gain=1.414 as in __init__).
    W = xavier_uniform(k_w, (in_features, out_features), gain=1.414)
    a = xavier_uniform(k_a, (2 * out_features, 1), gain=1.414)

    # Input node features and a deterministic edge list (incl. self-loops).
    x = jax.random.normal(k_x, (N, in_features), jnp.float32)
    src = jnp.arange(N, dtype=jnp.int32)
    dst = jnp.mod(src + 1, N)
    edge_index = jnp.stack(
        [jnp.concatenate([src, src]), jnp.concatenate([src, dst])], axis=0)

    adj_i8 = edges_to_dense_int8(edge_index, N)

    out = gat_layer(x, W, a, adj_i8, alpha=lrelu_alpha, concat=concat)
    jax.block_until_ready(out)

    ref = gat_reference(x, W, a, adj_i8, lrelu_alpha, concat)

    assert out.shape == (N, out_features)
    assert jnp.all(jnp.isfinite(out))
    # bf16 matmul operands => loose tolerance.
    assert jnp.allclose(out, ref, atol=5e-2, rtol=5e-2), float(
        jnp.max(jnp.abs(out - ref)))
    print("KERNEL_OK")
</pallas_src>

<mosaic_0001>
module attributes {stable_mosaic.version = 11 : i64} {
  func.func @_gat_proj_kernel(%arg0: i32, %arg1: memref<128x16xf32, #tpu.memory_space<vmem>>, %arg2: memref<16x128xf32, #tpu.memory_space<vmem>>, %arg3: memref<128x2xf32, #tpu.memory_space<vmem>>, %arg4: memref<128x128xbf16, #tpu.memory_space<vmem>>, %arg5: memref<128x2xf32, #tpu.memory_space<vmem>>) attributes {dimension_semantics = [#tpu.dimension_semantics<parallel>], iteration_bounds = array<i64: 1>, scalar_prefetch = 0 : i64, scratch_operands = 0 : i64, tpu.core_type = #tpu.core_type<tc>, window_params = [{transform_indices = @transform_0, window_bounds = array<i64: 128, 16>}, {pipeline_mode = #tpu.pipeline_mode<synchronous>, transform_indices = @transform_1, window_bounds = array<i64: 16, 128>}, {pipeline_mode = #tpu.pipeline_mode<synchronous>, transform_indices = @transform_2, window_bounds = array<i64: 128, 2>}, {transform_indices = @transform_3, window_bounds = array<i64: 128, 128>}, {transform_indices = @transform_4, window_bounds = array<i64: 128, 2>}]} {
    %c0 = arith.constant 0 : index
    %c0_0 = arith.constant 0 : index
    %0 = vector.load %arg1[%c0, %c0_0] : memref<128x16xf32, #tpu.memory_space<vmem>>, vector<128x16xf32>
    %c0_1 = arith.constant 0 : index
    %c0_2 = arith.constant 0 : index
    %1 = vector.load %arg2[%c0_1, %c0_2] : memref<16x128xf32, #tpu.memory_space<vmem>>, vector<16x128xf32>
    %cst = arith.constant dense<0.000000e+00> : vector<128x128xf32>
    %2 = tpu.matmul %0, %1, %cst {dimension_numbers = #tpu.dot_dimension_numbers<[1], [0], [0], [1], [0, 0, 1, 1], [], []>} : vector<128x16xf32>, vector<16x128xf32>, vector<128x128xf32> -> vector<128x128xf32>
    %c0_3 = arith.constant 0 : index
    %c0_4 = arith.constant 0 : index
    %3 = vector.load %arg3[%c0_3, %c0_4] : memref<128x2xf32, #tpu.memory_space<vmem>>, vector<128x2xf32>
    %cst_5 = arith.constant dense<0.000000e+00> : vector<128x2xf32>
    %4 = tpu.matmul %2, %3, %cst_5 {dimension_numbers = #tpu.dot_dimension_numbers<[1], [0], [0], [1], [0, 0, 1, 1], [], []>} : vector<128x128xf32>, vector<128x2xf32>, vector<128x2xf32> -> vector<128x2xf32>
    %5 = arith.truncf %2 : vector<128x128xf32> to vector<128x128xbf16>
    %c0_6 = arith.constant 0 : index
    %c0_7 = arith.constant 0 : index
    %6 = vector.load %arg4[%c0_6, %c0_7] : memref<128x128xbf16, #tpu.memory_space<vmem>>, vector<128x128xbf16>
    tpu.vector_store %arg4[%c0_6, %c0_7], %5 {strides = array<i32>} : memref<128x128xbf16, #tpu.memory_space<vmem>>, vector<128x128xbf16>,
    %c0_8 = arith.constant 0 : index
    %c0_9 = arith.constant 0 : index
    %7 = vector.load %arg5[%c0_8, %c0_9] : memref<128x2xf32, #tpu.memory_space<vmem>>, vector<128x2xf32>
    tpu.vector_store %arg5[%c0_8, %c0_9], %4 {strides = array<i32>} : memref<128x2xf32, #tpu.memory_space<vmem>>, vector<128x2xf32>,
    return
  }
  func.func @transform_0(%arg0: i32) -> (i32, i32) {
    %c0_i32 = arith.constant 0 : i32
    %c0_i32_0 = arith.constant 0 : i32
    return %arg0, %c0_i32 : i32, i32
  }
  func.func @transform_1(%arg0: i32) -> (i32, i32) {
    %c0_i32 = arith.constant 0 : i32
    %c0_i32_0 = arith.constant 0 : i32
    %c0_i32_1 = arith.constant 0 : i32
    return %c0_i32, %c0_i32_0 : i32, i32
  }
  func.func @transform_2(%arg0: i32) -> (i32, i32) {
    %c0_i32 = arith.constant 0 : i32
    %c0_i32_0 = arith.constant 0 : i32
    %c0_i32_1 = arith.constant 0 : i32
    return %c0_i32, %c0_i32_0 : i32, i32
  }
  func.func @transform_3(%arg0: i32) -> (i32, i32) {
    %c0_i32 = arith.constant 0 : i32
    %c0_i32_0 = arith.constant 0 : i32
    return %arg0, %c0_i32 : i32, i32
  }
  func.func @transform_4(%arg0: i32) -> (i32, i32) {
    %c0_i32 = arith.constant 0 : i32
    %c0_i32_0 = arith.constant 0 : i32
    return %arg0, %c0_i32 : i32, i32
  }
}

</mosaic_0001>

<bundles_post_ra>
// kernel: tpu_custom_call.1
= control target key start
LH: loop header
LB: loop body
LE: loop exit
PB: predicated region body
PF: predicated region fallthrough
CT: control target
= control target key end

     0   :  { %vm35_vm0 = vcmask 130048   ;;  %s640_s0 = inlined_call_operand.vmem [shape: f32[128,16], index: 0, kind: input, shape index: {}]   ;;  %s641_s1 = inlined_call_operand.vmem [shape: f32[16,128], index: 1, kind: input, shape index: {}]   ;;  %s642_s2 = inlined_call_operand.vmem [shape: f32[128,2], index: 2, kind: input, shape index: {}]   ;;  %s643_s3 = inlined_call_operand.hbm [shape: bf16[128,128], index: 3, kind: output, shape index: {0}]   ;;  %s644_s4 = inlined_call_operand.vmem [shape: f32[128,2], index: 4, kind: output, shape index: {1}]  }
   0x1   :  { %v34_v0 = vld [vmem:[%s641_s1 + $0x8] sm:$0xff]  ;;  %v33_v1 = vld [vmem:[%s641_s1] sm:$0xff] }
   0x2   :  { %98 = vmatpush.msra.mxu0 %v34_v0  ;;  %v17_v2 = vld [vmem:[%s640_s0] sm:$0xff]  ;;  %364 = vmatpush.msra.mxu3 %v34_v0 }
   0x3   :  { %10 = vsyncpa [#allocation3], 0  ;;  %v18_v3 = vld [vmem:[%s640_s0 + $0x8] sm:$0xff]  ;;  %v19_v4 = vld [vmem:[%s640_s0 + $0x10] sm:$0xff]  ;;  %s285_s30 = sshll.u32 %s643_s3, 4  ;;  %s428_s5 = smov 64   ;;  %s286_s30 = int_to_ptr.hbm [resolvable:$true] %s285_s30 }
   0x4   :  { %99 = vmatpush.msra.mxu0 %v33_v1  ;;  %365 = vmatpush.msra.mxu3 %v33_v1  ;;  %v27_v5 = vld [vmem:[%s640_s0 + $0x50] sm:$0xff]  ;;  %v20_v6 = vld [vmem:[%s640_s0 + $0x18] sm:$0xff]  ;;  %v21_v8 = vld [vmem:[%s640_s0 + $0x20] sm:$0xff]  ;;  %s429_s6 = smov 4   ;;  %vm262_vm1 = vcmask 15360  }
   0x5   :  { %301 = vmatmul.msk.f32.vlgmr.msra.gmra.mxu0 %vm35_vm0, %v17_v2  ;;  %311 = vmatmul.msk.f32.vlgmr.msra.gmra.mxu3 %vm35_vm0, %v27_v5  ;;  %v28_v7 = vld [vmem:[%s640_s0 + $0x58] sm:$0xff]  ;;  %v29_v9 = vld [vmem:[%s640_s0 + $0x60] sm:$0xff]  ;;  %v22_v10 = vld [vmem:[%s640_s0 + $0x28] sm:$0xff] }
   0x6   :  { %v30_v11 = vld [vmem:[%s640_s0 + $0x68] sm:$0xff]  ;;  %v164_v12 = vld [vmem:[%s642_s2 + $0x78] sm:$0xff]  ;;  %v163_v13 = vld [vmem:[%s642_s2 + $0x70] sm:$0xff] }
   0x7   :  { %165 = vmatpush.msra.mxu1 %v164_v12  ;;  %366 = vmatpush.msra.mxu2 %v164_v12  ;;  %v162_v14 = vld [vmem:[%s642_s2 + $0x68] sm:$0xff]  ;;  %v23_v15 = vld [vmem:[%s640_s0 + $0x30] sm:$0xff]  ;;  %v161_v16 = vld [vmem:[%s642_s2 + $0x60] sm:$0xff] }
   0x8   :  { %367 = vmatpush.msrb.mxu3 %v164_v12  ;;  %v31_v17 = vld [vmem:[%s640_s0 + $0x70] sm:$0xff]  ;;  %v160_v18 = vld [vmem:[%s642_s2 + $0x58] sm:$0xff]  ;;  %v158_v20 = vld [vmem:[%s642_s2 + $0x48] sm:$0xff] }
   0x9   :  { %166 = vmatpush.msra.mxu1 %v163_v13  ;;  %368 = vmatpush.msra.mxu2 %v163_v13  ;;  %v159_v19 = vld [vmem:[%s642_s2 + $0x50] sm:$0xff]  ;;  %v24_v21 = vld [vmem:[%s640_s0 + $0x38] sm:$0xff]  ;;  %v157_v22 = vld [vmem:[%s642_s2 + $0x40] sm:$0xff] }
   0xa   :  { %369 = vmatpush.msrb.mxu3 %v163_v13  ;;  %v32_v23 = vld [vmem:[%s640_s0 + $0x78] sm:$0xff]  ;;  %v155_v25 = vld [vmem:[%s642_s2 + $0x30] sm:$0xff]  ;;  %v154_v26 = vld [vmem:[%s642_s2 + $0x28] sm:$0xff] }
   0xb   :  { %167 = vmatpush.msra.mxu1 %v162_v14  ;;  %370 = vmatpush.msra.mxu2 %v162_v14  ;;  %v156_v24 = vld [vmem:[%s642_s2 + $0x38] sm:$0xff]  ;;  %v25_v27 = vld [vmem:[%s640_s0 + $0x40] sm:$0xff]  ;;  %v151_v30 = vld [vmem:[%s642_s2 + $0x10] sm:$0xff] }
   0xc   :  { %371 = vmatpush.msrb.mxu3 %v162_v14  ;;  %v153_v28 = vld [vmem:[%s642_s2 + $0x20] sm:$0xff]  ;;  %v152_v29 = vld [vmem:[%s642_s2 + $0x18] sm:$0xff]  ;;  %v150_v31 = vld [vmem:[%s642_s2 + $0x8] sm:$0xff] }
   0xd   :  { %302 = vmatmul.msk.f32.gmra.mxu0 %vm35_vm0, %v18_v3  ;;  %312 = vmatmul.msk.f32.gmra.mxu3 %vm35_vm0, %v28_v7  ;;  %v26_v32 = vld [vmem:[%s640_s0 + $0x48] sm:$0xff]  ;;  %v149_v33 = vld [vmem:[%s642_s2] sm:$0xff]  ;;  %s427_s0 = smov [#allocation2]  }
   0xe   :  { %168 = vmatpush.msra.mxu1 %v161_v16  ;;  %372 = vmatpush.msra.mxu2 %v161_v16  ;;  %s283_s2 = sshll.u32 %s427_s0, 4  ;;  %s284_s2 = int_to_ptr.vmem [resolvable:$true] %s283_s2 }
   0xf   :  { %373 = vmatpush.msrb.mxu3 %v161_v16 }
  0x10   :  { %169 = vmatpush.msra.mxu1 %v160_v18  ;;  %374 = vmatpush.msra.mxu2 %v160_v18 }
  0x11   :  { %375 = vmatpush.msrb.mxu3 %v160_v18 }
  0x12   :  { %170 = vmatpush.msra.mxu1 %v159_v19  ;;  %376 = vmatpush.msra.mxu2 %v159_v19 }
  0x13   :  { %377 = vmatpush.msrb.mxu3 %v159_v19 }
  0x14   :  { %171 = vmatpush.msra.mxu1 %v158_v20  ;;  %378 = vmatpush.msra.mxu2 %v158_v20 }
  0x15   :  { %303 = vmatmul.msk.f32.gmra.mxu0 %vm35_vm0, %v19_v4  ;;  %313 = vmatmul.msk.f32.gmra.mxu3 %vm35_vm0, %v29_v9 }
  0x16   :  { %172 = vmatpush.msra.mxu1 %v157_v22  ;;  %380 = vmatpush.msra.mxu2 %v157_v22 }
  0x17   :  { %379 = vmatpush.msrb.mxu3 %v158_v20 }
  0x18   :  { %173 = vmatpush.msra.mxu1 %v156_v24  ;;  %382 = vmatpush.msra.mxu2 %v156_v24 }
  0x19   :  { %381 = vmatpush.msrb.mxu3 %v157_v22 }
  0x1a   :  { %174 = vmatpush.msra.mxu1 %v155_v25  ;;  %384 = vmatpush.msra.mxu2 %v155_v25 }
  0x1b   :  { %383 = vmatpush.msrb.mxu3 %v156_v24 }
  0x1c   :  { %175 = vmatpush.msra.mxu1 %v154_v26  ;;  %386 = vmatpush.msra.mxu2 %v154_v26 }
  0x1d   :  { %304 = vmatmul.msk.f32.gmra.mxu0 %vm35_vm0, %v20_v6  ;;  %314 = vmatmul.msk.f32.gmra.mxu3 %vm35_vm0, %v30_v11 }
  0x1e   :  { %176 = vmatpush.msra.mxu1 %v153_v28  ;;  %388 = vmatpush.msra.mxu2 %v153_v28 }
  0x1f   :  { %385 = vmatpush.msrb.mxu3 %v155_v25 }
  0x20   :  { %177 = vmatpush.msra.mxu1 %v152_v29  ;;  %390 = vmatpush.msra.mxu2 %v152_v29 }
  0x21   :  { %387 = vmatpush.msrb.mxu3 %v154_v26 }
  0x22   :  { %178 = vmatpush.msra.mxu1 %v151_v30  ;;  %392 = vmatpush.msra.mxu2 %v151_v30 }
  0x23   :  { %389 = vmatpush.msrb.mxu3 %v153_v28 }
  0x24   :  { %179 = vmatpush.msra.mxu1 %v150_v31  ;;  %394 = vmatpush.msra.mxu2 %v150_v31 }
  0x25   :  { %305 = vmatmul.msk.f32.gmra.mxu0 %vm35_vm0, %v21_v8  ;;  %315 = vmatmul.msk.f32.gmra.mxu3 %vm35_vm0, %v31_v17 }
  0x26   :  { %391 = vmatpush.msrb.mxu3 %v152_v29  ;;  %180 = vmatpush.msra.mxu1 %v149_v33 }
  0x27   :  { %396 = vmatpush.msra.mxu2 %v149_v33 }
  0x28   :  { %393 = vmatpush.msrb.mxu3 %v151_v30 }
  0x2a   :  { %395 = vmatpush.msrb.mxu3 %v150_v31 }
  0x2c   :  { %397 = vmatpush.msrb.mxu3 %v149_v33 }
  0x2d   :  { %306 = vmatmul.msk.f32.gmra.mxu0 %vm35_vm0, %v22_v10  ;;  %316 = vmatmul.msk.f32.gmra.mxu3 %vm35_vm0, %v32_v23 }
  0x35   :  { %307 = vmatmul.msk.f32.gmra.mxu0 %vm35_vm0, %v23_v15 }
  0x3d   :  { %308 = vmatmul.msk.f32.gmra.mxu0 %vm35_vm0, %v24_v21 }
  0x45   :  { %309 = vmatmul.msk.f32.gmra.mxu0 %vm35_vm0, %v25_v27 }
  0x4d   :  { %310 = vmatmul.msk.f32.gmra.mxu0 %vm35_vm0, %v26_v32 }
  0x82   :  { %v101_v34 = vpop.f32.mrf.mxu0 }
  0x83   :  { %181 = vmatmul.f32.vlgmr.msra.gmra.mxu1 %v101_v34 }
  0x88   :  { %v131_v39 = vpop.f32.mrf.mxu3 }
  0x8a   :  { %v104_v35 = vpop.f32.mrf.mxu0 }
  0x8b   :  { %v320_v36 = vpack.c.bf16 %v104_v35, %v101_v34  ;;  %184 = vmatmul.f32.gmra.mxu1 %v104_v35 }
  0x8d   :  { %321 = vst [vmem:[#allocation2] sm:$0xff] %v320_v36  }
  0x90   :  { %v134_v42 = vpop.f32.mrf.mxu3 }
  0x91   :  { %v345_v43 = vpack.c.bf16 %v134_v42, %v131_v39 }
  0x92   :  { %v107_v37 = vpop.f32.mrf.mxu0 }
  0x93   :  { %187 = vmatmul.f32.gmra.mxu1 %v107_v37  ;;  %361 = vst [vmem:[#allocation2 + $0x28] sm:$0xff] %v345_v43  }
  0x98   :  { %v137_v45 = vpop.f32.mrf.mxu3 }
  0x9a   :  { %v110_v38 = vpop.f32.mrf.mxu0 }
  0x9b   :  { %v325_v40 = vpack.c.bf16 %v110_v38, %v107_v37  ;;  %190 = vmatmul.f32.gmra.mxu1 %v110_v38 }
  0x9d   :  { %357 = vst [vmem:[#allocation2 + $0x8] sm:$0xff] %v325_v40  }
  0xa0   :  { %v140_v48 = vpop.f32.mrf.mxu3 }
  0xa1   :  { %v350_v49 = vpack.c.bf16 %v140_v48, %v137_v45 }
  0xa2   :  { %v113_v41 = vpop.f32.mrf.mxu0 }
  0xa3   :  { %193 = vmatmul.f32.gmra.mxu1 %v113_v41  ;;  %362 = vst [vmem:[#allocation2 + $0x30] sm:$0xff] %v350_v49  }
  0xa8   :  { %v143_v51 = vpop.f32.mrf.mxu3 }
  0xa9   :  { %223 = vmatmul.f32.vlgmr.msrb.gmra.mxu3 %v143_v51 }
  0xaa   :  { %v116_v44 = vpop.f32.mrf.mxu0 }
  0xab   :  { %v330_v46 = vpack.c.bf16 %v116_v44, %v113_v41  ;;  %196 = vmatmul.f32.gmra.mxu1 %v116_v44 }
  0xad   :  { %358 = vst [vmem:[#allocation2 + $0x10] sm:$0xff] %v330_v46  }
  0xb0   :  { %v146_v54 = vpop.f32.mrf.mxu3 }
  0xb1   :  { %v355_v55 = vpack.c.bf16 %v146_v54, %v143_v51  ;;  %226 = vmatmul.f32.gmra.mxu3 %v146_v54 }
  0xb2   :  { %v119_v47 = vpop.f32.mrf.mxu0 }
  0xb3   :  { %199 = vmatmul.f32.gmra.mxu1 %v119_v47  ;;  %363 = vst [vmem:[#allocation2 + $0x38] sm:$0xff] %v355_v55  }
  0xba   :  { %v122_v50 = vpop.f32.mrf.mxu0 }
  0xbb   :  { %v335_v52 = vpack.c.bf16 %v122_v50, %v119_v47  ;;  %202 = vmatmul.f32.vlgmr.msra.gmra.mxu2 %v122_v50 }
  0xbd   :  { %359 = vst [vmem:[#allocation2 + $0x18] sm:$0xff] %v335_v52  }
  0xc2   :  { %v125_v53 = vpop.f32.mrf.mxu0 }
  0xc3   :  { %205 = vmatmul.f32.gmra.mxu2 %v125_v53 }
  0xca   :  { %v128_v56 = vpop.f32.mrf.mxu0 }
  0xcb   :  { %v340_v57 = vpack.c.bf16 %v128_v56, %v125_v53  ;;  %208 = vmatmul.f32.gmra.mxu2 %v128_v56 }
  0xcd   :  { %360 = vst [vmem:[#allocation2 + $0x20] sm:$0xff] %v340_v57  }
  0xce   :  { %291 = dma.vmem_to_hbm [thread:$0]  %s284_s2, 1024, %s286_s30, [#allocation3], %s428_s5, %s428_s5, %s429_s6  }
  0xd3   :  { %211 = vmatmul.f32.gmra.mxu2 %v131_v39 }
  0xdb   :  { %214 = vmatmul.f32.gmra.mxu2 %v134_v42 }
  0xe3   :  { %217 = vmatmul.f32.gmra.mxu2 %v137_v45 }
  0xeb   :  { %220 = vmatmul.f32.gmra.mxu2 %v140_v48 }
 0x100   :  { %v182_v58 = vpop.f32.mrf.mxu1 }
 0x101   :  { %263 = vst.msk [vmem:[%s644_s4] sm:$0xff] %vm262_vm1, %v182_v58 }
 0x108   :  { %v185_v59 = vpop.f32.mrf.mxu1 }
 0x109   :  { %264 = vst.msk [vmem:[%s644_s4 + $0x8] sm:$0xff] %vm262_vm1, %v185_v59 }
 0x110   :  { %v188_v60 = vpop.f32.mrf.mxu1 }
 0x111   :  { %265 = vst.msk [vmem:[%s644_s4 + $0x10] sm:$0xff] %vm262_vm1, %v188_v60 }
 0x118   :  { %v191_v61 = vpop.f32.mrf.mxu1 }
 0x119   :  { %266 = vst.msk [vmem:[%s644_s4 + $0x18] sm:$0xff] %vm262_vm1, %v191_v61 }
 0x120   :  { %v194_v62 = vpop.f32.mrf.mxu1 }
 0x121   :  { %267 = vst.msk [vmem:[%s644_s4 + $0x20] sm:$0xff] %vm262_vm1, %v194_v62 }
 0x128   :  { %v197_v63 = vpop.f32.mrf.mxu1 }
 0x129   :  { %268 = vst.msk [vmem:[%s644_s4 + $0x28] sm:$0xff] %vm262_vm1, %v197_v63 }
 0x12c   :  { %v224_v3 = vpop.f32.mrf.mxu3 }
 0x12d   :  { %277 = vst.msk [vmem:[%s644_s4 + $0x70] sm:$0xff] %vm262_vm1, %v224_v3 }
 0x130   :  { %v200_v0 = vpop.f32.mrf.mxu1 }
 0x131   :  { %269 = vst.msk [vmem:[%s644_s4 + $0x30] sm:$0xff] %vm262_vm1, %v200_v0 }
 0x134   :  { %v227_v5 = vpop.f32.mrf.mxu3 }
 0x135   :  { %278 = vst.msk [vmem:[%s644_s4 + $0x78] sm:$0xff] %vm262_vm1, %v227_v5 }
 0x13e   :  { %v203_v1 = vpop.f32.mrf.mxu2 }
 0x13f   :  { %270 = vst.msk [vmem:[%s644_s4 + $0x38] sm:$0xff] %vm262_vm1, %v203_v1 }
 0x146   :  { %v206_v2 = vpop.f32.mrf.mxu2 }
 0x147   :  { %271 = vst.msk [vmem:[%s644_s4 + $0x40] sm:$0xff] %vm262_vm1, %v206_v2 }
 0x14e   :  { %v209_v4 = vpop.f32.mrf.mxu2 }
 0x14f   :  { %272 = vst.msk [vmem:[%s644_s4 + $0x48] sm:$0xff] %vm262_vm1, %v209_v4 }
 0x156   :  { %v212_v6 = vpop.f32.mrf.mxu2 }
 0x157   :  { %273 = vst.msk [vmem:[%s644_s4 + $0x50] sm:$0xff] %vm262_vm1, %v212_v6 }
 0x15e   :  { %v215_v7 = vpop.f32.mrf.mxu2 }
 0x15f   :  { %274 = vst.msk [vmem:[%s644_s4 + $0x58] sm:$0xff] %vm262_vm1, %v215_v7 }
 0x166   :  { %v218_v8 = vpop.f32.mrf.mxu2 }
 0x167   :  { %275 = vst.msk [vmem:[%s644_s4 + $0x60] sm:$0xff] %vm262_vm1, %v218_v8 }
 0x16e   :  { %v221_v9 = vpop.f32.mrf.mxu2 }
 0x16f   :  { %276 = vst.msk [vmem:[%s644_s4 + $0x68] sm:$0xff] %vm262_vm1, %v221_v9 }
 0x170   :  { %425 = dma.done.wait [#allocation3], 1024  }
 0x171   :  { %426 = vsyncadd [#allocation3], 4294966272 }
 0x172   :  { %300 = vsyncpa [#allocation3], 1 }

</bundles_post_ra>
